<compile_context>
chip_gen: v7x
topology: tpu7x:2x2x1
jax: 0.10.0
libtpu: 0.0.40
codegen_flags: <defaults>
</compile_context>

<pallas_src>
import jax
import jax.numpy as jnp
from jax.experimental import pallas as pl
from jax.experimental.pallas import tpu as pltpu


def _round_up(n, m):
    return ((n + m - 1) // m) * m


def _multitask_kernel(x_ref, w_ref, b_ref, cls_ref, reg_ref):
    """One batch tile of the fused forward pass.

    x_ref  : (TB, F)      input tile in its native row-major layout
    w_ref  : (3, R, F)    packed weights (out, in): [trunk | fused hidden | fused out]
    b_ref  : (3, R, 1)    packed biases (broadcast over the batch/lane axis)
    cls_ref: (n_cls, TB)  classifier output tile (batch on the lane axis)
    reg_ref: (1, TB)      regressor output tile (batch on the lane axis)
    """
    R = w_ref.shape[1]          # padded row count of the packed slabs (static)
    n_cls = cls_ref.shape[0]

    x = x_ref[...]              # (TB, F) f32, batch on sublanes

    # Shared trunk: relu(W0 @ x^T + b0) -> (R, TB).  Contract the F axes of
    # BOTH operands so the result is batch-lane-dense without any wrapper-side
    # transpose of x.  Padded rows stay exact zeros.
    h = jax.lax.dot_general(
        w_ref[0], x, (((1,), (1,)), ((), ())),
        preferred_element_type=jnp.float32) + b_ref[0]
    h = jnp.maximum(h, 0.0)

    # Fused head hidden layer: rows 0..Hc-1 classifier, rows Hc.. regressor.
    h = jnp.dot(w_ref[1][:, :R], h, preferred_element_type=jnp.float32) + b_ref[1]
    h = jnp.maximum(h, 0.0)

    # Fused (block-diagonal) output layer: row 0..n_cls-1 = classifier,
    # row n_cls = regressor.  Lane-dense (rows, TB) stores.
    y = jnp.dot(w_ref[2][:, :R], h, preferred_element_type=jnp.float32) + b_ref[2]
    cls_ref[...] = y[:n_cls, :].astype(cls_ref.dtype)
    reg_ref[...] = y[n_cls:n_cls + 1, :].astype(reg_ref.dtype)


def _pack_params(p):
    """Pack the 10 small weight/bias tensors into two zero-padded VMEM slabs.

    Returns (w_slab (3,R,C), b_slab (3,R,1), n_cls) with weights stored (out,in).
    NOTE: assumes the input feature width is the widest layer (C == F) and a
    single regressor output; non-default l_sizes that violate this trip the
    assert below rather than silently miscomputing.
    """
    F, H = p["w_com"].shape            # 16, 8  (trunk in/out)
    Hc = p["w_c1"].shape[1]            # 4
    Hr = p["w_r1"].shape[1]            # 4
    n_cls = p["w_c2"].shape[1]         # class_op_size (default 1)
    n_out = n_cls + 1

    R = max(H, Hc + Hr, n_out)
    C = max(F, H, Hc + Hr)
    assert C == F, "packing assumes the input feature dim is the widest layer"

    w = jnp.zeros((3, R, C), jnp.float32)
    w = w.at[0, :H, :F].set(p["w_com"].T)                      # trunk (H, F)
    w = w.at[1, :Hc, :H].set(p["w_c1"].T)                      # cls hidden rows
    w = w.at[1, Hc:Hc + Hr, :H].set(p["w_r1"].T)               # reg hidden rows
    w = w.at[2, :n_cls, :Hc].set(p["w_c2"].T)                  # cls out (block-diag)
    w = w.at[2, n_cls, Hc:Hc + Hr].set(p["w_r2"][:, 0])        # reg out (block-diag)

    b = jnp.zeros((3, R, 1), jnp.float32)
    b = b.at[0, :H, 0].set(p["b_com"][0])
    b = b.at[1, :Hc, 0].set(p["b_c1"][0])
    b = b.at[1, Hc:Hc + Hr, 0].set(p["b_r1"][0])
    b = b.at[2, :n_cls, 0].set(p["b_c2"][0])
    b = b.at[2, n_cls, 0].set(p["b_r2"][0, 0])
    return w, b, n_cls


def multitask_nn_corr(x, params, *, tb_max=8192):
    """MultiTaskNNCorr forward pass via one Pallas kernel.

    Args:
      x: (B, 16) float32 input in its natural layout (never copied/transposed).
      params: dict of weight/bias arrays (see init_params), weights as (in, out).
      tb_max: max batch-tile height per grid step.  8192 amortizes the
              ~0.35us per-step overhead while keeping the double-buffered
              VMEM footprint ~10 MiB (safe on v5e/v6e and on v7x's 64 MiB VMEM).
    Returns:
      (cls_out, reg_out): (B, class_op_size) and (B, 1) float32.
    """
    B, F = x.shape
    w_slab, b_slab, n_cls = _pack_params(params)
    assert w_slab.shape[2] == F, "input feature dim must match the model"
    n_out = n_cls + 1

    # Batch tile: as large as possible to amortize grid-step overhead, but once
    # B > 128 keep >= 2 grid steps so both v7x TensorCores get work.
    TB = min(tb_max, _round_up(pl.cdiv(B, 2), 128))
    grid = (pl.cdiv(B, TB),)   # ragged last block handled by Pallas clamping

    H = params["w_com"].shape[1]
    fused_hidden = params["w_c1"].shape[1] + params["w_r1"].shape[1]
    flops = 2 * B * (F * H + H * fused_hidden + fused_hidden * n_out)
    bytes_accessed = 4 * B * (F + n_out)

    x = x.astype(jnp.float32)

    cls_t, reg_t = pl.pallas_call(
        _multitask_kernel,
        out_shape=(jax.ShapeDtypeStruct((n_cls, B), jnp.float32),
                   jax.ShapeDtypeStruct((1, B), jnp.float32)),
        grid=grid,
        in_specs=[
            # Streamed, double-buffered batch tile in native (B, F) layout:
            # one contiguous DMA per tile, no wrapper pad / transpose.
            pl.BlockSpec((TB, F), lambda i: (i, 0)),
            # Weights / biases: constant block index -> fetched once, resident
            # in VMEM across all grid steps (12 KiB total).
            pl.BlockSpec(w_slab.shape, lambda i: (0, 0, 0)),
            pl.BlockSpec(b_slab.shape, lambda i: (0, 0, 0)),
        ],
        out_specs=(
            pl.BlockSpec((n_cls, TB), lambda i: (0, i)),
            pl.BlockSpec((1, TB), lambda i: (0, i)),
        ),
        compiler_params=pltpu.CompilerParams(
            dimension_semantics=("parallel",),  # shard batch tiles across TCs (v7x)
        ),
        cost_estimate=pl.CostEstimate(
            flops=int(flops), transcendentals=0, bytes_accessed=int(bytes_accessed)),
    )(x, w_slab, b_slab)

    # Degenerate-dim transposes: free reshapes for class_op_size == 1.
    return cls_t.T, reg_t.T


def init_params(key, com_sizes=(16, 8), c_sizes=(8, 4), r_sizes=(8, 4), class_op_size=1):
    """Deterministic synthetic parameter init (weights as (in, out))."""
    def linear(k, fan_in, fan_out):
        kw, kb = jax.random.split(k)
        bound = 1.0 / jnp.sqrt(fan_in)
        w = jax.random.uniform(kw, (fan_in, fan_out), jnp.float32, -bound, bound)
        b = jax.random.uniform(kb, (1, fan_out), jnp.float32, -bound, bound)
        return w, b

    keys = jax.random.split(key, 5)
    w_com, b_com = linear(keys[0], com_sizes[0], com_sizes[1])
    w_c1, b_c1 = linear(keys[1], c_sizes[0], c_sizes[1])
    w_c2, b_c2 = linear(keys[2], c_sizes[-1], class_op_size)
    w_r1, b_r1 = linear(keys[3], r_sizes[0], r_sizes[1])
    w_r2, b_r2 = linear(keys[4], r_sizes[-1], 1)
    return {
        "w_com": w_com, "b_com": b_com,
        "w_c1": w_c1, "b_c1": b_c1,
        "w_c2": w_c2, "b_c2": b_c2,
        "w_r1": w_r1, "b_r1": b_r1,
        "w_r2": w_r2, "b_r2": b_r2,
    }


def _reference(x, p):
    """Pure-JAX f32 reference of the same forward pass (correctness check)."""
    hi = jax.lax.Precision.HIGHEST
    h = jnp.maximum(jnp.dot(x, p["w_com"], precision=hi) + p["b_com"], 0.0)
    hc = jnp.maximum(jnp.dot(h, p["w_c1"], precision=hi) + p["b_c1"], 0.0)
    cls = jnp.dot(hc, p["w_c2"], precision=hi) + p["b_c2"]
    hr = jnp.maximum(jnp.dot(h, p["w_r1"], precision=hi) + p["b_r1"], 0.0)
    reg = jnp.dot(hr, p["w_r2"], precision=hi) + p["b_r2"]
    return cls, reg


if __name__ == "__main__":
    key = jax.random.PRNGKey(0)
    k_p, k_x1, k_x2 = jax.random.split(key, 3)

    params = init_params(k_p)
    F = 16

    # Small, module-scale batch: single (clamped) block, 1-step grid.
    B1 = 8
    x1 = jax.random.normal(k_x1, (B1, F), jnp.float32)
    cls1, reg1 = multitask_nn_corr(x1, params)
    jax.block_until_ready((cls1, reg1))
    rc1, rr1 = _reference(x1, params)
    assert cls1.shape == (B1, 1) and reg1.shape == (B1, 1)
    assert jnp.allclose(cls1, rc1, atol=1e-4, rtol=1e-4)
    assert jnp.allclose(reg1, rr1, atol=1e-4, rtol=1e-4)

    # Non-tile-aligned batch with a small tile cap: 3-step "parallel" grid with
    # a ragged final block (exercises the no-padding clamped-tail path).
    B2 = 300
    x2 = jax.random.normal(k_x2, (B2, F), jnp.float32)
    cls2, reg2 = multitask_nn_corr(x2, params, tb_max=128)
    jax.block_until_ready((cls2, reg2))
    rc2, rr2 = _reference(x2, params)
    assert cls2.shape == (B2, 1) and reg2.shape == (B2, 1)
    assert jnp.allclose(cls2, rc2, atol=1e-4, rtol=1e-4)
    assert jnp.allclose(reg2, rr2, atol=1e-4, rtol=1e-4)

    print("KERNEL_OK")
</pallas_src>

<mosaic_0001>
module attributes {stable_mosaic.version = 11 : i64} {
  func.func @_multitask_kernel(%arg0: i32, %arg1: memref<128x16xf32, #tpu.memory_space<vmem>>, %arg2: memref<3x8x16xf32, #tpu.memory_space<vmem>>, %arg3: memref<3x8x1xf32, #tpu.memory_space<vmem>>, %arg4: memref<1x128xf32, #tpu.memory_space<vmem>>, %arg5: memref<1x128xf32, #tpu.memory_space<vmem>>) attributes {dimension_semantics = [#tpu.dimension_semantics<parallel>], iteration_bounds = array<i64: 1>, scalar_prefetch = 0 : i64, scratch_operands = 0 : i64, tpu.core_type = #tpu.core_type<tc>, window_params = [{transform_indices = @transform_0, window_bounds = array<i64: 128, 16>}, {pipeline_mode = #tpu.pipeline_mode<synchronous>, transform_indices = @transform_1, window_bounds = array<i64: 3, 8, 16>}, {pipeline_mode = #tpu.pipeline_mode<synchronous>, transform_indices = @transform_2, window_bounds = array<i64: 3, 8, 1>}, {transform_indices = @transform_3, window_bounds = array<i64: 1, 128>}, {transform_indices = @transform_4, window_bounds = array<i64: 1, 128>}]} {
    %c0 = arith.constant 0 : index
    %c0_0 = arith.constant 0 : index
    %0 = vector.load %arg1[%c0, %c0_0] : memref<128x16xf32, #tpu.memory_space<vmem>>, vector<128x16xf32>
    %c0_1 = arith.constant 0 : index
    %c0_2 = arith.constant 0 : index
    %c0_3 = arith.constant 0 : index
    %1 = vector.load %arg2[%c0_1, %c0_2, %c0_3] : memref<3x8x16xf32, #tpu.memory_space<vmem>>, vector<1x8x16xf32>
    %2 = vector.shape_cast %1 : vector<1x8x16xf32> to vector<8x16xf32>
    %cst = arith.constant dense<0.000000e+00> : vector<8x128xf32>
    %3 = tpu.matmul %2, %0, %cst {dimension_numbers = #tpu.dot_dimension_numbers<[1], [1], [0], [0], [0, 0, 1, 0], [], []>} : vector<8x16xf32>, vector<128x16xf32>, vector<8x128xf32> -> vector<8x128xf32>
    %c0_4 = arith.constant 0 : index
    %c0_5 = arith.constant 0 : index
    %c0_6 = arith.constant 0 : index
    %4 = vector.load %arg3[%c0_4, %c0_5, %c0_6] : memref<3x8x1xf32, #tpu.memory_space<vmem>>, vector<1x8x1xf32>
    %5 = vector.shape_cast %4 : vector<1x8x1xf32> to vector<8x1xf32>
    %6 = vector.broadcast %5 : vector<8x1xf32> to vector<8x128xf32>
    %7 = arith.addf %3, %6 : vector<8x128xf32>
    %cst_7 = arith.constant 0.000000e+00 : f32
    %8 = vector.broadcast %cst_7 : f32 to vector<8x128xf32>
    %9 = arith.maximumf %7, %8 : vector<8x128xf32>
    %c1 = arith.constant 1 : index
    %c0_8 = arith.constant 0 : index
    %c0_9 = arith.constant 0 : index
    %10 = vector.load %arg2[%c1, %c0_8, %c0_9] : memref<3x8x16xf32, #tpu.memory_space<vmem>>, vector<1x8x16xf32>
    %11 = vector.shape_cast %10 : vector<1x8x16xf32> to vector<8x16xf32>
    %12 = vector.extract_strided_slice %11 {offsets = [0, 0], sizes = [8, 8], strides = [1, 1]} : vector<8x16xf32> to vector<8x8xf32>
    %cst_10 = arith.constant dense<0.000000e+00> : vector<8x128xf32>
    %13 = tpu.matmul %12, %9, %cst_10 {dimension_numbers = #tpu.dot_dimension_numbers<[1], [0], [0], [1], [0, 0, 1, 1], [], []>} : vector<8x8xf32>, vector<8x128xf32>, vector<8x128xf32> -> vector<8x128xf32>
    %c1_11 = arith.constant 1 : index
    %c0_12 = arith.constant 0 : index
    %c0_13 = arith.constant 0 : index
    %14 = vector.load %arg3[%c1_11, %c0_12, %c0_13] : memref<3x8x1xf32, #tpu.memory_space<vmem>>, vector<1x8x1xf32>
    %15 = vector.shape_cast %14 : vector<1x8x1xf32> to vector<8x1xf32>
    %16 = vector.broadcast %15 : vector<8x1xf32> to vector<8x128xf32>
    %17 = arith.addf %13, %16 : vector<8x128xf32>
    %cst_14 = arith.constant 0.000000e+00 : f32
    %18 = vector.broadcast %cst_14 : f32 to vector<8x128xf32>
    %19 = arith.maximumf %17, %18 : vector<8x128xf32>
    %c2 = arith.constant 2 : index
    %c0_15 = arith.constant 0 : index
    %c0_16 = arith.constant 0 : index
    %20 = vector.load %arg2[%c2, %c0_15, %c0_16] : memref<3x8x16xf32, #tpu.memory_space<vmem>>, vector<1x8x16xf32>
    %21 = vector.shape_cast %20 : vector<1x8x16xf32> to vector<8x16xf32>
    %22 = vector.extract_strided_slice %21 {offsets = [0, 0], sizes = [8, 8], strides = [1, 1]} : vector<8x16xf32> to vector<8x8xf32>
    %cst_17 = arith.constant dense<0.000000e+00> : vector<8x128xf32>
    %23 = tpu.matmul %22, %19, %cst_17 {dimension_numbers = #tpu.dot_dimension_numbers<[1], [0], [0], [1], [0, 0, 1, 1], [], []>} : vector<8x8xf32>, vector<8x128xf32>, vector<8x128xf32> -> vector<8x128xf32>
    %c2_18 = arith.constant 2 : index
    %c0_19 = arith.constant 0 : index
    %c0_20 = arith.constant 0 : index
    %24 = vector.load %arg3[%c2_18, %c0_19, %c0_20] : memref<3x8x1xf32, #tpu.memory_space<vmem>>, vector<1x8x1xf32>
    %25 = vector.shape_cast %24 : vector<1x8x1xf32> to vector<8x1xf32>
    %26 = vector.broadcast %25 : vector<8x1xf32> to vector<8x128xf32>
    %27 = arith.addf %23, %26 : vector<8x128xf32>
    %28 = vector.extract_strided_slice %27 {offsets = [0, 0], sizes = [1, 128], strides = [1, 1]} : vector<8x128xf32> to vector<1x128xf32>
    %c0_21 = arith.constant 0 : index
    %c0_22 = arith.constant 0 : index
    %29 = vector.load %arg4[%c0_21, %c0_22] : memref<1x128xf32, #tpu.memory_space<vmem>>, vector<1x128xf32>
    tpu.vector_store %arg4[%c0_21, %c0_22], %28 {strides = array<i32>} : memref<1x128xf32, #tpu.memory_space<vmem>>, vector<1x128xf32>,
    %30 = vector.extract_strided_slice %27 {offsets = [1, 0], sizes = [1, 128], strides = [1, 1]} : vector<8x128xf32> to vector<1x128xf32>
    %c0_23 = arith.constant 0 : index
    %c0_24 = arith.constant 0 : index
    %31 = vector.load %arg5[%c0_23, %c0_24] : memref<1x128xf32, #tpu.memory_space<vmem>>, vector<1x128xf32>
    tpu.vector_store %arg5[%c0_23, %c0_24], %30 {strides = array<i32>} : memref<1x128xf32, #tpu.memory_space<vmem>>, vector<1x128xf32>,
    return
  }
  func.func @transform_0(%arg0: i32) -> (i32, i32) {
    %c0_i32 = arith.constant 0 : i32
    %c0_i32_0 = arith.constant 0 : i32
    return %arg0, %c0_i32 : i32, i32
  }
  func.func @transform_1(%arg0: i32) -> (i32, i32, i32) {
    %c0_i32 = arith.constant 0 : i32
    %c0_i32_0 = arith.constant 0 : i32
    %c0_i32_1 = arith.constant 0 : i32
    %c0_i32_2 = arith.constant 0 : i32
    return %c0_i32, %c0_i32_0, %c0_i32_1 : i32, i32, i32
  }
  func.func @transform_2(%arg0: i32) -> (i32, i32, i32) {
    %c0_i32 = arith.constant 0 : i32
    %c0_i32_0 = arith.constant 0 : i32
    %c0_i32_1 = arith.constant 0 : i32
    %c0_i32_2 = arith.constant 0 : i32
    return %c0_i32, %c0_i32_0, %c0_i32_1 : i32, i32, i32
  }
  func.func @transform_3(%arg0: i32) -> (i32, i32) {
    %c0_i32 = arith.constant 0 : i32
    %c0_i32_0 = arith.constant 0 : i32
    return %c0_i32, %arg0 : i32, i32
  }
  func.func @transform_4(%arg0: i32) -> (i32, i32) {
    %c0_i32 = arith.constant 0 : i32
    %c0_i32_0 = arith.constant 0 : i32
    return %c0_i32, %arg0 : i32, i32
  }
}

</mosaic_0001>

<bundles_post_ra>
// kernel: tpu_custom_call.1
= control target key start
LH: loop header
LB: loop body
LE: loop exit
PB: predicated region body
PF: predicated region fallthrough
CT: control target
= control target key end

     0   :  { %10 = vsyncpa [#allocation3], 0  ;;  %s706_s0 = inlined_call_operand.hbm [shape: f32[8,16], index: 0, kind: input, shape index: {}]   ;;  %s707_s1 = inlined_call_operand.vmem [shape: f32[3,8,16], index: 1, kind: input, shape index: {}]   ;;  %s708_s2 = inlined_call_operand.vmem [shape: f32[3,8,1], index: 2, kind: input, shape index: {}]   ;;  %s709_s3 = inlined_call_operand.hbm [shape: f32[1,8], index: 3, kind: output, shape index: {0}]   ;;  %s710_s4 = inlined_call_operand.hbm [shape: f32[1,8], index: 4, kind: output, shape index: {1}]  }
   0x1   :  { %11 = vsyncpa [#allocation4], 0 }
   0x2   :  { %12 = vsyncpa [#allocation7], 0 }
   0x3   :  { %17 = vsyncadd [#allocation3], 1920  ;;  %s579_s15 = smov [#allocation2]   ;;  %s507_s19 = scalar_lea.hbm %s706_s0, 128 }
   0x4   :  { %s18_s16 = sshll.u32 %s579_s15, 4  ;;  %p508_p0 = scmp.ne.s32.totalorder %s706_s0, %s507_s19  ;;  %s19_s16 = int_to_ptr.vmem [resolvable:$true] %s18_s16 }
   0x5   :  { %p511_p1 = scmp.lt.u32.totalorder %s507_s19, %s706_s0 }
   0x7   :  { %p513_p2 = pnand %p511_p1, %p508_p0 }
   0x9   :  { %516 = shalt.err (!%p513_p2)
}
   0xa   :  { %s517_s24 = scalar_lea.vmem %s19_s16, 128  ;;  %s521_s25 = scalar_lea.vmem %s19_s16, 2048 }
   0xb   :  { %p518_p3 = scmp.ne.s32.totalorder %s19_s16, %s517_s24  ;;  %p522_p4 = scmp.lt.s32.totalorder %s19_s16, %s19_s16 }
   0xc   :  { %p523_p5 = scmp.lt.s32.totalorder %s521_s25, %s517_s24 }
   0xe   :  { %p524_p6 = por %p523_p5, %p522_p4 }
  0x10   :  { %p525_p7 = pnand %p524_p6, %p518_p3 }
  0x12   :  { %528 = shalt.err (!%p525_p7)
}
  0x13   :  { %s580_s26 = smov 128   ;;  %s581_s27 = smov 8  }
  0x14   :  { %24 = dma.hbm_to_vmem [thread:$0]  %s706_s0, 128, %s19_s16, [#allocation3], %s580_s26, %s580_s26, %s581_s27  }
  0x15   :  { %573 = dma.done.wait [#allocation3], 2048  }
  0x16   :  { %574 = vsyncadd [#allocation3], 4294965248  ;;  %v582_v0 = vmov 0.0|0.0   ;;  %vm583_vm0 = vmmov 0   ;;  %v584_v1 = vmov 0.0   ;;  %v585_v2 = vmov 0  }
  0x17   :  { %464 = vmatprep.subr.bf16.mxu0 %v582_v0  ;;  %451 = vmatprep.mubr.msk.f32.mxu0 %vm583_vm0, %v584_v1  ;;  %vm55_vm1 = vcmask 130048   ;;  %v32_v3 = vld [vmem:[#allocation2] sm:$0xff]  ;;  %v33_v4 = vld [vmem:[#allocation2 + $0x8] sm:$0xff]  ;;  %v34_v7 = vld [vmem:[#allocation2 + $0x10] sm:$0xff]  ;;  %vm187_vm3 = vcmask 64512   ;;  %s586_s15 = smov [#allocation5]  }
  0x18   :  { %505 = vset.pattern.permute.xlu0 %v585_v2  ;;  %454 = vmatprep.subr.mxu1 %v584_v1  ;;  %vm632_vm2 = vmpackc.low %vm55_vm1, %vm55_vm1  ;;  %v465_v6 = vpack.c.bf16 %v33_v4, %v32_v3  ;;  %v35_v8 = vld [vmem:[#allocation2 + $0x18] sm:$0xff]  ;;  %v49_v9 = vld [vmem:[%s708_s2] sm:$0xff]  ;;  %s352_s16 = sshll.u32 %s586_s15, 4  ;;  %s587_s17 = smov [#allocation6]   ;;  %s353_s16 = int_to_ptr.vmem [resolvable:$true] %s352_s16 }
  0x19   :  { %456 = vmatprep.mubr.msk.f32.mxu1 %vm583_vm0, %v584_v1  ;;  %506 = vset.pattern.permute.xlu1 %v585_v2  ;;  %v469_v10 = vpack.c.bf16 %v35_v8, %v34_v7  ;;  %v393_v11 = vld [vmem:[%s708_s2 + $0x8] sm:$0xff]  ;;  %v36_v12 = vld [vmem:[#allocation2 + $0x20] sm:$0xff]  ;;  %v38_v15 = vld [vmem:[#allocation2 + $0x30] sm:$0xff]  ;;  %s362_s18 = sshll.u32 %s587_s17, 4  ;;  %s533_s19 = scalar_lea.vmem %s353_s16, 32  ;;  %s674_s18 = int_to_ptr.vmem [resolvable:$true] %s362_s18 }
  0x1a   :  { %467 = vmatpush3.bf16.xpose.msk.msra.mxu0 %vm632_vm2, %v465_v6  ;;  %52 = vperm.xlu0 %505, %v49_v9   ;;  %v37_v13 = vld [vmem:[#allocation2 + $0x28] sm:$0xff]  ;;  %v39_v16 = vld [vmem:[#allocation2 + $0x38] sm:$0xff]  ;;  %v40_v18 = vld [vmem:[#allocation2 + $0x40] sm:$0xff]  ;;  %p534_p9 = scmp.lt.s32.totalorder %s353_s16, %s353_s16 }
  0x1b   :  { %468 = vmatprep.subr.bf16.mxu0 %v582_v0  ;;  %v473_v14 = vpack.c.bf16 %v37_v13, %v36_v12  ;;  %v477_v17 = vpack.c.bf16 %v39_v16, %v38_v15  ;;  %v41_v19 = vld [vmem:[#allocation2 + $0x48] sm:$0xff]  ;;  %v42_v21 = vld [vmem:[#allocation2 + $0x50] sm:$0xff]  ;;  %v43_v22 = vld [vmem:[#allocation2 + $0x58] sm:$0xff] }
  0x1c   :  { %v481_v20 = vpack.c.bf16 %v41_v19, %v40_v18  ;;  %v485_v23 = vpack.c.bf16 %v43_v22, %v42_v21  ;;  %v44_v24 = vld [vmem:[#allocation2 + $0x60] sm:$0xff]  ;;  %v45_v25 = vld [vmem:[#allocation2 + $0x68] sm:$0xff]  ;;  %v46_v27 = vld [vmem:[#allocation2 + $0x70] sm:$0xff] }
  0x1d   :  { %v489_v26 = vpack.c.bf16 %v45_v25, %v44_v24  ;;  %v47_v28 = vld [vmem:[#allocation2 + $0x78] sm:$0xff]  ;;  %v48_v30 = vld [vmem:[%s707_s1] sm:$0xff]  ;;  %v392_v36 = vld [vmem:[%s707_s1 + $0x8] sm:$0xff] }
  0x1e   :  { %184 = vperm.xlu0 %505, %v393_v11   ;;  %v493_v29 = vpack.c.bf16 %v47_v28, %v46_v27  ;;  %v396_v37 = vld [vmem:[%s708_s2 + $0x10] sm:$0xff]  ;;  %s529_s2 = scalar_lea.vmem %s353_s16, 16 }
  0x1f   :  { %268 = vperm.xlu1 %506, %v396_v37   ;;  %v395_v43 = vld [vmem:[%s707_s1 + $0x10] sm:$0xff]  ;;  %p530_p8 = scmp.ne.s32.totalorder %s353_s16, %s529_s2  ;;  %p535_p10 = scmp.lt.s32.totalorder %s533_s19, %s529_s2 }
  0x21   :  { %p536_p11 = por %p535_p10, %p534_p9 }
  0x22   :  { %471 = vmatpush3.bf16.xpose.msk.msra.mxu0 %vm632_vm2, %v469_v10 }
  0x23   :  { %472 = vmatprep.subr.bf16.mxu0 %v582_v0  ;;  %p537_p12 = pnand %p536_p11, %p530_p8 }
  0x2a   :  { %475 = vmatpush3.bf16.xpose.msk.msra.mxu0 %vm632_vm2, %v473_v14 }
  0x2b   :  { %476 = vmatprep.subr.bf16.mxu0 %v582_v0 }
  0x32   :  { %479 = vmatpush3.bf16.xpose.msk.msra.mxu0 %vm632_vm2, %v477_v17 }
  0x33   :  { %480 = vmatprep.subr.bf16.mxu0 %v582_v0 }
  0x3a   :  { %483 = vmatpush3.bf16.xpose.msk.msra.mxu0 %vm632_vm2, %v481_v20 }
  0x3b   :  { %484 = vmatprep.subr.bf16.mxu0 %v582_v0 }
  0x42   :  { %487 = vmatpush3.bf16.xpose.msk.msra.mxu0 %vm632_vm2, %v485_v23 }
  0x43   :  { %488 = vmatprep.subr.bf16.mxu0 %v582_v0 }
  0x4a   :  { %491 = vmatpush3.bf16.xpose.msk.msra.mxu0 %vm632_vm2, %v489_v26 }
  0x4b   :  { %492 = vmatprep.subr.bf16.mxu0 %v582_v0 }
  0x52   :  { %495 = vmatpush3.bf16.xpose.msk.msra.mxu0 %vm632_vm2, %v493_v29 }
  0x59   :  { %452 = vmatmul.mubr.msk.f32.vlgmr.msra.gmra.mrb[0].mxu0 %vm55_vm1, %v48_v30 }
  0x99   :  { %v53_v31 = vpop.permute.xlu0 %52 }
  0x9d   :  { %v185_v38 = vpop.permute.xlu0 %184 }
  0x9e   :  { %v269_v44 = vpop.permute.xlu1 %268 }
 0x12c   :  { %v173_v32 = vpop.f32.mrb[0].mxu0 }
 0x12d   :  { %v174_v33 = vadd.f32 %v173_v32, %v53_v31  ;;  %v453_v34 = vpop.f32.mrb[1].mxu0 }
 0x12f   :  { %v177_v35 = vmax.f32 %v174_v33, 0.0 }
 0x131   :  { %455 = vmatpush3.msra.mxu1 %v177_v35 }
 0x132   :  { %457 = vmatmul.mubr.msk.f32.vlgmr.msra.gmra.mrb[0].mxu1 %vm187_vm3, %v392_v36  ;;  %459 = vmatprep.subr.mxu1 %v584_v1 }
 0x133   :  { %461 = vmatprep.mubr.msk.f32.mxu1 %vm583_vm0, %v584_v1 }
 0x205   :  { %v257_v39 = vpop.f32.mrb[0].mxu1 }
 0x206   :  { %v258_v40 = vadd.f32 %v257_v39, %v185_v38  ;;  %v458_v41 = vpop.f32.mrb[1].mxu1 }
 0x208   :  { %v261_v42 = vmax.f32 %v258_v40, 0.0 }
 0x20a   :  { %460 = vmatpush3.msra.mxu1 %v261_v42 }
 0x20b   :  { %462 = vmatmul.mubr.msk.f32.vlgmr.msra.gmra.mrb[2].mxu1 %vm187_vm3, %v395_v43 }
 0x2de   :  { %v340_v45 = vpop.f32.mrb[2].mxu1 }
 0x2df   :  { %v341_v46 = vadd.f32 %v340_v45, %v269_v44  ;;  %v463_v47 = vpop.f32.mrb[3].mxu1 }
 0x2e1   :  { %344 = vst [vmem:[#allocation5] sm:$0x1] %v341_v46  ;;  %345 = vst [vmem:[#allocation6 - $0x1] sm:$0x2] %v341_v46 }
 0x2e2   :  { %540 = shalt.err (!%p537_p12)
}
 0x2e3   :  { %s541_s21 = scalar_lea.hbm %s709_s3, 16 }
 0x2e4   :  { %p542_p13 = scmp.ne.s32.totalorder %s709_s3, %s541_s21  ;;  %p545_p0 = scmp.lt.u32.totalorder %s541_s21, %s709_s3 }
 0x2e6   :  { %p547_p1 = pnand %p545_p0, %p542_p13 }
 0x2e8   :  { %550 = shalt.err (!%p547_p1)
}
 0x2e9   :  { %355 = dma.vmem_to_hbm [thread:$0]  %s353_s16, 16, %s709_s3, [#allocation4]  }
 0x2ea   :  { %s551_s28 = scalar_lea.vmem %s674_s18, 16  ;;  %s555_s29 = scalar_lea.vmem %s674_s18, 32 }
 0x2eb   :  { %p552_p2 = scmp.ne.s32.totalorder %s674_s18, %s551_s28  ;;  %p556_p3 = scmp.lt.s32.totalorder %s674_s18, %s674_s18 }
 0x2ec   :  { %p557_p4 = scmp.lt.s32.totalorder %s555_s29, %s551_s28 }
 0x2ee   :  { %p558_p5 = por %p557_p4, %p556_p3 }
 0x2f0   :  { %p559_p6 = pnand %p558_p5, %p552_p2 }
 0x2f2   :  { %562 = shalt.err (!%p559_p6)
}
 0x2f3   :  { %s563_s5 = scalar_lea.hbm %s710_s4, 16 }
 0x2f4   :  { %p564_p7 = scmp.ne.s32.totalorder %s710_s4, %s563_s5  ;;  %p567_p8 = scmp.lt.u32.totalorder %s563_s5, %s710_s4 }
 0x2f6   :  { %p569_p9 = pnand %p567_p8, %p564_p7 }
 0x2f8   :  { %572 = shalt.err (!%p569_p9)
}
 0x2f9   :  { %365 = dma.vmem_to_hbm [thread:$0]  %s674_s18, 16, %s710_s4, [#allocation7]  }
 0x2fa   :  { %575 = dma.done.wait [#allocation4], 16  }
 0x2fb   :  { %576 = vsyncadd [#allocation4], 4294967280 }
 0x2fc   :  { %577 = dma.done.wait [#allocation7], 16  }
 0x2fd   :  { %578 = vsyncadd [#allocation7], 4294967280 }
 0x2fe   :  { %372 = vsyncpa [#allocation3], 1 }
 0x2ff   :  { %373 = vsyncpa [#allocation4], 1 }
 0x300   :  { %374 = vsyncpa [#allocation7], 1 }

</bundles_post_ra>
